<compile_context>
chip_gen: v7x
topology: tpu7x:2x2x1
jax: 0.10.0
libtpu: 0.0.40
codegen_flags: <defaults>
</compile_context>

<pallas_src>
import functools

import jax
import jax.numpy as jnp
from jax.experimental import pallas as pl
from jax.experimental.pallas import tpu as pltpu


def _round_up(n, m):
    return ((n + m - 1) // m) * m


def _pad2(a, rows, cols):
    return jnp.pad(a, ((0, rows - a.shape[0]), (0, cols - a.shape[1])))


def _leaky_relu(x, slope=0.2):
    return jnp.where(x > 0, x, slope * x)


def _make_kernel(out_dim, compute_dtype):
    def mlp_kernel(x_ref,
                   w1_ref, b1_ref,
                   w2_ref, b2_ref,
                   w3_ref, b3_ref,
                   w4t_ref, b4_ref,
                   o_ref):
        # f32 -> bf16 cast done in-kernel (VPU cast hides under the x DMA).
        x = x_ref[...].astype(compute_dtype)

        h = jnp.dot(x, w1_ref[...], preferred_element_type=jnp.float32)
        h = _leaky_relu(h + b1_ref[...])            # dropout -> identity (eval)

        h = jnp.dot(h.astype(compute_dtype), w2_ref[...],
                    preferred_element_type=jnp.float32)
        h = _leaky_relu(h + b2_ref[...])            # dropout -> identity (eval)

        h = jnp.dot(h.astype(compute_dtype), w3_ref[...],
                    preferred_element_type=jnp.float32)
        h = _leaky_relu(h + b3_ref[...])            # dropout -> identity (eval)

        if out_dim == 1:
            # Lane-dense epilogue: (1, D3P) x (TB, D3P)^T -> (1, TB) row,
            # stored unmasked. MXU has slack; the kernel is HBM-bound.
            out = jax.lax.dot_general(
                w4t_ref[...], h.astype(compute_dtype),
                dimension_numbers=(((1,), (1,)), ((), ())),
                preferred_element_type=jnp.float32)
            o_ref[...] = (out + b4_ref[0]).astype(o_ref.dtype)  # b4: SMEM scalar
        else:
            out = jax.lax.dot_general(
                h.astype(compute_dtype), w4t_ref[...],
                dimension_numbers=(((1,), (1,)), ((), ())),
                preferred_element_type=jnp.float32)
            o_ref[...] = (out + b4_ref[...]).astype(o_ref.dtype)

    return mlp_kernel


def prepare_params(params, compute_dtype=jnp.bfloat16):
    """One-time weight prep (hoisted out of the per-call path): zero-pad hidden
    dims to 128-lane multiples and cast weights to the MXU compute dtype."""
    (w1, b1), (w2, b2), (w3, b3), (w4, b4) = params
    K = w1.shape[0]
    OUT = w4.shape[1]
    D1P = _round_up(w1.shape[1], 128)
    D2P = _round_up(w2.shape[1], 128)
    D3P = _round_up(w3.shape[1], 128)

    w1p = _pad2(w1, K, D1P).astype(compute_dtype)
    b1p = _pad2(b1.reshape(1, -1), 1, D1P).astype(jnp.float32)
    w2p = _pad2(w2, D1P, D2P).astype(compute_dtype)
    b2p = _pad2(b2.reshape(1, -1), 1, D2P).astype(jnp.float32)
    w3p = _pad2(w3, D2P, D3P).astype(compute_dtype)
    b3p = _pad2(b3.reshape(1, -1), 1, D3P).astype(jnp.float32)
    w4tp = _pad2(w4.T, OUT, D3P).astype(compute_dtype)     # stored transposed
    b4p = b4.astype(jnp.float32)                           # (OUT,)
    return (w1p, b1p, w2p, b2p, w3p, b3p, w4tp, b4p)


@functools.partial(jax.jit, static_argnames=("tb_max",))
def discriminator_forward(x, prepared, *, tb_max=2048):
    """Forward pass of D. x: anything reshapable to (-1, 784) (e.g. NCHW)."""
    w1p, b1p, w2p, b2p, w3p, b3p, w4tp, b4p = prepared
    K, D1P = w1p.shape
    D2P = w2p.shape[1]
    D3P = w3p.shape[1]
    OUT = w4tp.shape[0]
    compute_dtype = w1p.dtype

    # x.view(-1, 28*28).to(float32); no host-side bf16 cast, no batch pad.
    xf = jnp.reshape(x, (-1, K)).astype(jnp.float32)
    B = xf.shape[0]

    # Batch tile: multiple of 16, capped at tb_max, shrunk so large batches
    # produce >=2 grid steps (so "parallel" can shard across v7x TensorCores).
    TB = min(tb_max, _round_up(B, 16))
    if B > 512 and (B + TB - 1) // TB < 2:
        TB = _round_up((B + 1) // 2, 16)
    G = (B + TB - 1) // TB            # last x block may be partial (clipped)

    const2 = lambda i: (0, 0)         # weights/biases stay VMEM-resident

    in_specs = [
        pl.BlockSpec((TB, K), lambda i: (i, 0)),            # streamed x tiles
        pl.BlockSpec((K, D1P), const2), pl.BlockSpec((1, D1P), const2),
        pl.BlockSpec((D1P, D2P), const2), pl.BlockSpec((1, D2P), const2),
        pl.BlockSpec((D2P, D3P), const2), pl.BlockSpec((1, D3P), const2),
        pl.BlockSpec((OUT, D3P), const2),
    ]

    if OUT == 1:
        in_specs.append(pl.BlockSpec(memory_space=pltpu.MemorySpace.SMEM))
        b4_arg = b4p                                        # (1,) scalar in SMEM
        out_shape = jax.ShapeDtypeStruct((G, TB), jnp.float32)
        out_specs = pl.BlockSpec((1, TB), lambda i: (i, 0))  # lane-dense rows
    else:
        in_specs.append(pl.BlockSpec((1, OUT), const2))
        b4_arg = b4p.reshape(1, OUT)
        out_shape = jax.ShapeDtypeStruct((B, OUT), jnp.float32)
        out_specs = pl.BlockSpec((TB, OUT), lambda i: (i, 0))

    # Double-buffered f32 x tile + bf16 copy + f32 intermediates, with headroom;
    # capped for v7x's 64 MiB physical VMEM.
    x_tile_bytes = TB * K * xf.dtype.itemsize
    vmem_limit = int(min(60 * 1024 * 1024,
                         max(32 * 1024 * 1024, 5 * x_tile_bytes + (8 << 20))))

    out = pl.pallas_call(
        _make_kernel(OUT, compute_dtype),
        out_shape=out_shape,
        grid=(G,),
        in_specs=in_specs,
        out_specs=out_specs,
        compiler_params=pltpu.CompilerParams(
            dimension_semantics=("parallel",),
            vmem_limit_bytes=vmem_limit,
        ),
    )(xf, w1p, b1p, w2p, b2p, w3p, b3p, w4tp, b4_arg)

    if OUT == 1:
        # (G, TB) lane-dense slab -> (B, 1); tail rows from the clipped last
        # x block are garbage and are discarded here.
        return out.reshape(-1)[:B].reshape(B, 1)
    return out


def init_params(key, input_l, output_l_d, hidden_dim):
    """Deterministic synthetic init matching nn.Linear shapes.
    Weights stored as (in, out); biases as (out,)."""
    dims = [
        (input_l, hidden_dim * 2),
        (hidden_dim * 2, hidden_dim * 4),
        (hidden_dim * 4, hidden_dim * 2),
        (hidden_dim * 2, output_l_d),
    ]
    params = []
    for i, (fan_in, fan_out) in enumerate(dims):
        kw, kb, key = jax.random.split(jax.random.fold_in(key, i), 3)
        bound = 1.0 / jnp.sqrt(fan_in)
        w = jax.random.uniform(kw, (fan_in, fan_out), jnp.float32, -bound, bound)
        b = jax.random.uniform(kb, (fan_out,), jnp.float32, -bound, bound)
        params.append((w, b))
    return params


def _reference_forward(x, params):
    """Pure-JAX f32 reference (eval-mode dropout = identity)."""
    (w1, b1), (w2, b2), (w3, b3), (w4, b4) = params
    h = jnp.reshape(x, (-1, w1.shape[0])).astype(jnp.float32)
    h = _leaky_relu(h @ w1 + b1)
    h = _leaky_relu(h @ w2 + b2)
    h = _leaky_relu(h @ w3 + b3)
    return h @ w4 + b4


if __name__ == "__main__":
    key = jax.random.PRNGKey(0)
    k_x, k_p = jax.random.split(key)

    input_l = 28 * 28      # 784 — forced by x.view(-1, 28*28)
    output_l_d = 1
    hidden_dim = 32

    # Small NCHW input consistent with the forward's view(-1, 784).
    x = jax.random.normal(k_x, (2, 1, 28, 28), dtype=jnp.float32)
    params = init_params(k_p, input_l, output_l_d, hidden_dim)

    prepared = prepare_params(params)          # one-time weight prep (hoisted)
    out = discriminator_forward(x, prepared)
    jax.block_until_ready(out)

    assert out.shape == (2, output_l_d), out.shape
    assert out.dtype == jnp.float32

    # Loose tolerance: kernel uses bf16 weights/activations with f32 accumulate.
    ref = _reference_forward(x, params)
    assert jnp.allclose(out, ref, atol=1e-1, rtol=1e-1), (out, ref)

    print("KERNEL_OK")
</pallas_src>

<mosaic_0001>
module attributes {stable_mosaic.version = 11 : i64} {
  func.func @mlp_kernel(%arg0: i32, %arg1: memref<16x784xf32, #tpu.memory_space<vmem>>, %arg2: memref<784x128xbf16, #tpu.memory_space<vmem>>, %arg3: memref<1x128xf32, #tpu.memory_space<vmem>>, %arg4: memref<128x128xbf16, #tpu.memory_space<vmem>>, %arg5: memref<1x128xf32, #tpu.memory_space<vmem>>, %arg6: memref<128x128xbf16, #tpu.memory_space<vmem>>, %arg7: memref<1x128xf32, #tpu.memory_space<vmem>>, %arg8: memref<1x128xbf16, #tpu.memory_space<vmem>>, %arg9: memref<1xf32, #tpu.memory_space<smem>>, %arg10: memref<1x16xf32, #tpu.memory_space<vmem>>) attributes {dimension_semantics = [#tpu.dimension_semantics<parallel>], iteration_bounds = array<i64: 1>, scalar_prefetch = 0 : i64, scratch_operands = 0 : i64, tpu.core_type = #tpu.core_type<tc>, window_params = [{transform_indices = @transform_0, window_bounds = array<i64: 16, 784>}, {pipeline_mode = #tpu.pipeline_mode<synchronous>, transform_indices = @transform_1, window_bounds = array<i64: 784, 128>}, {pipeline_mode = #tpu.pipeline_mode<synchronous>, transform_indices = @transform_2, window_bounds = array<i64: 1, 128>}, {pipeline_mode = #tpu.pipeline_mode<synchronous>, transform_indices = @transform_3, window_bounds = array<i64: 128, 128>}, {pipeline_mode = #tpu.pipeline_mode<synchronous>, transform_indices = @transform_4, window_bounds = array<i64: 1, 128>}, {pipeline_mode = #tpu.pipeline_mode<synchronous>, transform_indices = @transform_5, window_bounds = array<i64: 128, 128>}, {pipeline_mode = #tpu.pipeline_mode<synchronous>, transform_indices = @transform_6, window_bounds = array<i64: 1, 128>}, {pipeline_mode = #tpu.pipeline_mode<synchronous>, transform_indices = @transform_7, window_bounds = array<i64: 1, 128>}, {transform_indices = @transform_8, window_bounds = array<i64: 1>}, {transform_indices = @transform_9, window_bounds = array<i64: 1, 16>}]} {
    %c0 = arith.constant 0 : index
    %c0_0 = arith.constant 0 : index
    %0 = vector.load %arg1[%c0, %c0_0] : memref<16x784xf32, #tpu.memory_space<vmem>>, vector<16x784xf32>
    %1 = arith.truncf %0 : vector<16x784xf32> to vector<16x784xbf16>
    %c0_1 = arith.constant 0 : index
    %c0_2 = arith.constant 0 : index
    %2 = vector.load %arg2[%c0_1, %c0_2] : memref<784x128xbf16, #tpu.memory_space<vmem>>, vector<784x128xbf16>
    %cst = arith.constant dense<0.000000e+00> : vector<16x128xf32>
    %3 = tpu.matmul %1, %2, %cst {dimension_numbers = #tpu.dot_dimension_numbers<[1], [0], [0], [1], [0, 0, 1, 1], [], []>} : vector<16x784xbf16>, vector<784x128xbf16>, vector<16x128xf32> -> vector<16x128xf32>
    %c0_3 = arith.constant 0 : index
    %c0_4 = arith.constant 0 : index
    %4 = vector.load %arg3[%c0_3, %c0_4] : memref<1x128xf32, #tpu.memory_space<vmem>>, vector<1x128xf32>
    %5 = vector.broadcast %4 : vector<1x128xf32> to vector<16x128xf32>
    %6 = arith.addf %3, %5 : vector<16x128xf32>
    %cst_5 = arith.constant 0.000000e+00 : f32
    %7 = vector.broadcast %cst_5 : f32 to vector<16x128xf32>
    %8 = arith.cmpf ogt, %6, %7 : vector<16x128xf32>
    %cst_6 = arith.constant 2.000000e-01 : f32
    %9 = vector.broadcast %cst_6 : f32 to vector<16x128xf32>
    %10 = arith.mulf %9, %6 : vector<16x128xf32>
    %11 = arith.select %8, %6, %10 : vector<16x128xi1>, vector<16x128xf32>
    %12 = arith.truncf %11 : vector<16x128xf32> to vector<16x128xbf16>
    %c0_7 = arith.constant 0 : index
    %c0_8 = arith.constant 0 : index
    %13 = vector.load %arg4[%c0_7, %c0_8] : memref<128x128xbf16, #tpu.memory_space<vmem>>, vector<128x128xbf16>
    %cst_9 = arith.constant dense<0.000000e+00> : vector<16x128xf32>
    %14 = tpu.matmul %12, %13, %cst_9 {dimension_numbers = #tpu.dot_dimension_numbers<[1], [0], [0], [1], [0, 0, 1, 1], [], []>} : vector<16x128xbf16>, vector<128x128xbf16>, vector<16x128xf32> -> vector<16x128xf32>
    %c0_10 = arith.constant 0 : index
    %c0_11 = arith.constant 0 : index
    %15 = vector.load %arg5[%c0_10, %c0_11] : memref<1x128xf32, #tpu.memory_space<vmem>>, vector<1x128xf32>
    %16 = vector.broadcast %15 : vector<1x128xf32> to vector<16x128xf32>
    %17 = arith.addf %14, %16 : vector<16x128xf32>
    %cst_12 = arith.constant 0.000000e+00 : f32
    %18 = vector.broadcast %cst_12 : f32 to vector<16x128xf32>
    %19 = arith.cmpf ogt, %17, %18 : vector<16x128xf32>
    %cst_13 = arith.constant 2.000000e-01 : f32
    %20 = vector.broadcast %cst_13 : f32 to vector<16x128xf32>
    %21 = arith.mulf %20, %17 : vector<16x128xf32>
    %22 = arith.select %19, %17, %21 : vector<16x128xi1>, vector<16x128xf32>
    %23 = arith.truncf %22 : vector<16x128xf32> to vector<16x128xbf16>
    %c0_14 = arith.constant 0 : index
    %c0_15 = arith.constant 0 : index
    %24 = vector.load %arg6[%c0_14, %c0_15] : memref<128x128xbf16, #tpu.memory_space<vmem>>, vector<128x128xbf16>
    %cst_16 = arith.constant dense<0.000000e+00> : vector<16x128xf32>
    %25 = tpu.matmul %23, %24, %cst_16 {dimension_numbers = #tpu.dot_dimension_numbers<[1], [0], [0], [1], [0, 0, 1, 1], [], []>} : vector<16x128xbf16>, vector<128x128xbf16>, vector<16x128xf32> -> vector<16x128xf32>
    %c0_17 = arith.constant 0 : index
    %c0_18 = arith.constant 0 : index
    %26 = vector.load %arg7[%c0_17, %c0_18] : memref<1x128xf32, #tpu.memory_space<vmem>>, vector<1x128xf32>
    %27 = vector.broadcast %26 : vector<1x128xf32> to vector<16x128xf32>
    %28 = arith.addf %25, %27 : vector<16x128xf32>
    %cst_19 = arith.constant 0.000000e+00 : f32
    %29 = vector.broadcast %cst_19 : f32 to vector<16x128xf32>
    %30 = arith.cmpf ogt, %28, %29 : vector<16x128xf32>
    %cst_20 = arith.constant 2.000000e-01 : f32
    %31 = vector.broadcast %cst_20 : f32 to vector<16x128xf32>
    %32 = arith.mulf %31, %28 : vector<16x128xf32>
    %33 = arith.select %30, %28, %32 : vector<16x128xi1>, vector<16x128xf32>
    %c0_21 = arith.constant 0 : index
    %c0_22 = arith.constant 0 : index
    %34 = vector.load %arg8[%c0_21, %c0_22] : memref<1x128xbf16, #tpu.memory_space<vmem>>, vector<1x128xbf16>
    %35 = arith.truncf %33 : vector<16x128xf32> to vector<16x128xbf16>
    %cst_23 = arith.constant dense<0.000000e+00> : vector<1x16xf32>
    %36 = tpu.matmul %34, %35, %cst_23 {dimension_numbers = #tpu.dot_dimension_numbers<[1], [1], [0], [0], [0, 0, 1, 0], [], []>} : vector<1x128xbf16>, vector<16x128xbf16>, vector<1x16xf32> -> vector<1x16xf32>
    %c0_24 = arith.constant 0 : index
    %37 = memref.load %arg9[%c0_24] : memref<1xf32, #tpu.memory_space<smem>>
    %38 = vector.broadcast %37 : f32 to vector<1x16xf32>
    %39 = arith.addf %36, %38 : vector<1x16xf32>
    %c0_25 = arith.constant 0 : index
    %c0_26 = arith.constant 0 : index
    %40 = vector.load %arg10[%c0_25, %c0_26] : memref<1x16xf32, #tpu.memory_space<vmem>>, vector<1x16xf32>
    tpu.vector_store %arg10[%c0_25, %c0_26], %39 {strides = array<i32>} : memref<1x16xf32, #tpu.memory_space<vmem>>, vector<1x16xf32>,
    return
  }
  func.func @transform_0(%arg0: i32) -> (i32, i32) {
    %c0_i32 = arith.constant 0 : i32
    %c0_i32_0 = arith.constant 0 : i32
    return %arg0, %c0_i32 : i32, i32
  }
  func.func @transform_1(%arg0: i32) -> (i32, i32) {
    %c0_i32 = arith.constant 0 : i32
    %c0_i32_0 = arith.constant 0 : i32
    %c0_i32_1 = arith.constant 0 : i32
    return %c0_i32, %c0_i32_0 : i32, i32
  }
  func.func @transform_2(%arg0: i32) -> (i32, i32) {
    %c0_i32 = arith.constant 0 : i32
    %c0_i32_0 = arith.constant 0 : i32
    %c0_i32_1 = arith.constant 0 : i32
    return %c0_i32, %c0_i32_0 : i32, i32
  }
  func.func @transform_3(%arg0: i32) -> (i32, i32) {
    %c0_i32 = arith.constant 0 : i32
    %c0_i32_0 = arith.constant 0 : i32
    %c0_i32_1 = arith.constant 0 : i32
    return %c0_i32, %c0_i32_0 : i32, i32
  }
  func.func @transform_4(%arg0: i32) -> (i32, i32) {
    %c0_i32 = arith.constant 0 : i32
    %c0_i32_0 = arith.constant 0 : i32
    %c0_i32_1 = arith.constant 0 : i32
    return %c0_i32, %c0_i32_0 : i32, i32
  }
  func.func @transform_5(%arg0: i32) -> (i32, i32) {
    %c0_i32 = arith.constant 0 : i32
    %c0_i32_0 = arith.constant 0 : i32
    %c0_i32_1 = arith.constant 0 : i32
    return %c0_i32, %c0_i32_0 : i32, i32
  }
  func.func @transform_6(%arg0: i32) -> (i32, i32) {
    %c0_i32 = arith.constant 0 : i32
    %c0_i32_0 = arith.constant 0 : i32
    %c0_i32_1 = arith.constant 0 : i32
    return %c0_i32, %c0_i32_0 : i32, i32
  }
  func.func @transform_7(%arg0: i32) -> (i32, i32) {
    %c0_i32 = arith.constant 0 : i32
    %c0_i32_0 = arith.constant 0 : i32
    %c0_i32_1 = arith.constant 0 : i32
    return %c0_i32, %c0_i32_0 : i32, i32
  }
  func.func @transform_8(%arg0: i32) -> i32 {
    %c0_i32 = arith.constant 0 : i32
    %c0_i32_0 = arith.constant 0 : i32
    return %c0_i32 : i32
  }
  func.func @transform_9(%arg0: i32) -> (i32, i32) {
    %c0_i32 = arith.constant 0 : i32
    %c0_i32_0 = arith.constant 0 : i32
    return %arg0, %c0_i32 : i32, i32
  }
}

</mosaic_0001>

<bundles_post_ra>
// kernel: discriminator_forward.1
= control target key start
LH: loop header
LB: loop body
LE: loop exit
PB: predicated region body
PF: predicated region fallthrough
CT: control target
= control target key end

     0   :  { %15 = vsyncpa [#allocation4], 0  ;;  %s1433_s30 = smov [#allocation3]   ;;  %s1660_s0 = inlined_call_operand.vmem [shape: f32[2,784], index: 0, kind: input, shape index: {}]   ;;  %s1661_s1 = inlined_call_operand.hbm [shape: bf16[784,128], index: 1, kind: input, shape index: {}]   ;;  %s1662_s2 = inlined_call_operand.vmem [shape: f32[1,128], index: 2, kind: input, shape index: {}]   ;;  %s1663_s3 = inlined_call_operand.vmem [shape: bf16[128,128], index: 3, kind: input, shape index: {}]   ;;  %s1664_s4 = inlined_call_operand.vmem [shape: f32[1,128], index: 4, kind: input, shape index: {}]   ;;  %s1665_s5 = inlined_call_operand.vmem [shape: bf16[128,128], index: 5, kind: input, shape index: {}]   ;;  %s1666_s6 = inlined_call_operand.vmem [shape: f32[1,128], index: 6, kind: input, shape index: {}]   ;;  %s1667_s7 = inlined_call_operand.vmem [shape: bf16[1,128], index: 7, kind: input, shape index: {}]   ;;  %s1668_s8 = inlined_call_operand.<no memory space> [shape: f32[1], index: 8, kind: input, shape index: {}]   ;;  %s1669_s9 = inlined_call_operand.vmem [shape: f32[1,16], index: 9, kind: output, shape index: {}]  }
   0x1   :  { %s23_s10 = sshll.u32 %s1433_s30, 4  ;;  %s1409_s13 = scalar_lea.hbm %s1661_s1, 6272  ;;  %s24_s10 = int_to_ptr.vmem [resolvable:$true] %s23_s10 }
   0x2   :  { %p1410_p0 = scmp.ne.s32.totalorder %s1661_s1, %s1409_s13  ;;  %p1413_p1 = scmp.lt.u32.totalorder %s1409_s13, %s1661_s1 }
   0x4   :  { %p1415_p2 = pnand %p1413_p1, %p1410_p0 }
   0x6   :  { %1418 = shalt.err (!%p1415_p2)
}
   0x7   :  { %s1419_s18 = scalar_lea.vmem %s24_s10, 6272  ;;  %p1424_p4 = scmp.lt.s32.totalorder %s24_s10, %s24_s10 }
   0x8   :  { %p1420_p3 = scmp.ne.s32.totalorder %s24_s10, %s1419_s18  ;;  %p1425_p5 = scmp.lt.s32.totalorder %s1419_s18, %s1419_s18 }
   0xa   :  { %p1426_p6 = por %p1425_p5, %p1424_p4 }
   0xc   :  { %p1427_p7 = pnand %p1426_p6, %p1420_p3 }
   0xe   :  { %1430 = shalt.err (!%p1427_p7)
}
   0xf   :  { %s1434_s19 = smov 64   ;;  %s1435_s20 = smov 4  }
  0x10   :  { %29 = dma.hbm_to_vmem [thread:$0]  %s1661_s1, 6272, %s24_s10, [#allocation4], %s1434_s19, %s1434_s19, %s1435_s20  }
  0x11   :  { %1431 = dma.done.wait [#allocation4], 6272  }
  0x12   :  { %1432 = vsyncadd [#allocation4], 4294961024  ;;  %v1320_v0 = vld [vmem:[#allocation3 + $0x40] sm:$0xff]   ;;  %v1324_v4 = vld [vmem:[#allocation3 + $0x48] sm:$0xff]   ;;  %v1436_v24 = vmov 1983009808   ;;  %v87_v26 = vlaneseq }
  0x13   :  { %v1321_v1 = vld [vmem:[#allocation3] sm:$0xff]   ;;  %1174 = vmatprep.subr.bf16.mxu0 %v1320_v0  ;;  %v1325_v5 = vld [vmem:[#allocation3 + $0x8] sm:$0xff]   ;;  %v1328_v8 = vld [vmem:[#allocation3 + $0x50] sm:$0xff]   ;;  %v85_v25 = vunpack.c.l.s4 %v1436_v24  ;;  %v1437_v58 = vmov 0.0   ;;  %vm1438_vm0 = vmmov 0   ;;  %vm642_vm1 = vcmask 130048  }
  0x14   :  { %v1322_v2 = vld [vmem:[#allocation3 + $0xc0] sm:$0xff]   ;;  %1175 = vmatpush3.bf16.msra.mxu0 %v1321_v1  ;;  %v1326_v6 = vld [vmem:[#allocation3 + $0xc8] sm:$0xff]   ;;  %v1329_v9 = vld [vmem:[#allocation3 + $0x10] sm:$0xff]   ;;  %v88_v32 = vshrl.u32 %v87_v26, 7  ;;  %vm1098_vm8 = vcmask 122880  }
  0x15   :  { %v1323_v3 = vld [vmem:[#allocation3 + $0x80] sm:$0xff]   ;;  %1196 = vmatprep.subr.bf16.mxu1 %v1322_v2  ;;  %1176 = vmatprep.subr.bf16.mxu0 %v1324_v4  ;;  %v1327_v7 = vld [vmem:[#allocation3 + $0x88] sm:$0xff]   ;;  %v1330_v10 = vld [vmem:[#allocation3 + $0xd0] sm:$0xff]   ;;  %v86_v31 = vunpack.c.0.s8 %v85_v25 }
  0x16   :  { %1197 = vmatpush3.bf16.msra.mxu1 %v1323_v3  ;;  %v1331_v11 = vld [vmem:[#allocation3 + $0x90] sm:$0xff]   ;;  %v1332_v12 = vld [vmem:[#allocation3 + $0x58] sm:$0xff]   ;;  %v1336_v16 = vld [vmem:[#allocation3 + $0x60] sm:$0xff]  }
  0x17   :  { %1198 = vmatprep.subr.bf16.mxu1 %v1326_v6  ;;  %v1333_v13 = vld [vmem:[#allocation3 + $0x18] sm:$0xff]   ;;  %v1337_v17 = vld [vmem:[#allocation3 + $0x20] sm:$0xff]   ;;  %v1340_v20 = vld [vmem:[#allocation3 + $0x68] sm:$0xff]   ;;  %v1501_v36 = vsub.s32 %v86_v31, %v88_v32 }
  0x18   :  { %1177 = vmatpush3.bf16.msra.mxu0 %v1325_v5  ;;  %v1334_v14 = vld [vmem:[#allocation3 + $0xd8] sm:$0xff]   ;;  %v1338_v18 = vld [vmem:[#allocation3 + $0xe0] sm:$0xff]   ;;  %v1341_v21 = vld [vmem:[#allocation3 + $0x28] sm:$0xff]  }
  0x19   :  { %1178 = vmatprep.subr.bf16.mxu0 %v1328_v8  ;;  %v1335_v15 = vld [vmem:[#allocation3 + $0x98] sm:$0xff]   ;;  %v1339_v19 = vld [vmem:[#allocation3 + $0xa0] sm:$0xff]   ;;  %v1342_v22 = vld [vmem:[#allocation3 + $0xe8] sm:$0xff]  }
  0x1a   :  { %1199 = vmatpush3.bf16.msra.mxu1 %v1327_v7  ;;  %v1343_v23 = vld [vmem:[#allocation3 + $0xa8] sm:$0xff]   ;;  %v1344_v27 = vld [vmem:[#allocation3 + $0x70] sm:$0xff]   ;;  %v1348_v33 = vld [vmem:[#allocation3 + $0x78] sm:$0xff]  }
  0x1b   :  { %1200 = vmatprep.subr.bf16.mxu1 %v1330_v10  ;;  %v1345_v28 = vld [vmem:[#allocation3 + $0x30] sm:$0xff]   ;;  %v1349_v34 = vld [vmem:[#allocation3 + $0x38] sm:$0xff]   ;;  %v1360_v46 = vld [vmem:[#allocation3 + $0x140] sm:$0xff]  }
  0x1c   :  { %1179 = vmatpush3.bf16.msra.mxu0 %v1329_v9  ;;  %v1346_v29 = vld [vmem:[#allocation3 + $0xf0] sm:$0xff]   ;;  %v1350_v35 = vld [vmem:[#allocation3 + $0xf8] sm:$0xff]   ;;  %v1365_v62 = vld [vmem:[#allocation3 + $0x100] sm:$0xff]  }
  0x1d   :  { %1180 = vmatprep.subr.bf16.mxu0 %v1332_v12  ;;  %v1347_v30 = vld [vmem:[#allocation3 + $0xb0] sm:$0xff]   ;;  %v1353_v38 = vld [vmem:[%s1660_s0 + $0x1c] ss:$14 sps:$4 sm:$0xff]   ;;  %v1355_v39 = vld [vmem:[%s1660_s0 + $0x38] ss:$14 sps:$4 sm:$0xff]  }
  0x1e   :  { %1201 = vmatpush3.bf16.msra.mxu1 %v1331_v11  ;;  %v1351_v37 = vld [vmem:[%s1660_s0] ss:$14 sps:$4 sm:$0xff]   ;;  %v1359_v42 = vld [vmem:[#allocation3 + $0xb8] sm:$0xff]   ;;  %v104_v43 = vrot.slane %v1353_v38, %v1501_v36  ;;  %v161_v44 = vrot.slane %v1355_v39, %v1501_v36  ;;  %v1361_v47 = vld [vmem:[%s1660_s0 + $0x4] ss:$14 sps:$4 sm:$0xff]  }
  0x1f   :  { %1202 = vmatprep.subr.bf16.mxu1 %v1334_v14  ;;  %v1357_v40 = vld [vmem:[%s1660_s0 + $0x54] ss:$14 sps:$4 sm:$0xff]   ;;  %v90_v41 = vrot.slane %v1351_v37, %v1501_v36  ;;  %v1363_v49 = vld [vmem:[%s1660_s0 + $0x3c] ss:$14 sps:$4 sm:$0xff]   ;;  %v1364_v54 = vld [vmem:[%s1660_s0 + $0x58] ss:$14 sps:$4 sm:$0xff]   ;;  %v97_v55 = vrot.slane %v1361_v47, %v1501_v36 }
  0x20   :  { %1181 = vmatpush3.bf16.msra.mxu0 %v1333_v13  ;;  %v175_v45 = vrot.slane %v1357_v40, %v1501_v36  ;;  %v1362_v48 = vld [vmem:[%s1660_s0 + $0x20] ss:$14 sps:$4 sm:$0xff]   ;;  %v168_v57 = vrot.slane %v1363_v49, %v1501_v36  ;;  %v182_v61 = vrot.slane %v1364_v54, %v1501_v36  ;;  %v1370_v9 = vld [vmem:[#allocation3 + $0x158] sm:$0xff]  }
  0x21   :  { %1182 = vmatprep.subr.bf16.mxu0 %v1336_v16  ;;  %v113_v50 = vcombine.high %v90_v41, %v104_v43  ;;  %v112_v52 = vcombine.low %v90_v41, %v104_v43  ;;  %v111_v56 = vrot.slane %v1362_v48, %v1501_v36  ;;  %v1366_v1 = vld [vmem:[#allocation3 + $0x148] sm:$0xff]   ;;  %v1368_v7 = vld [vmem:[#allocation3 + $0x150] sm:$0xff]   ;;  %v1371_v10 = vld [vmem:[#allocation3 + $0x118] sm:$0xff]  }
  0x22   :  { %1203 = vmatpush3.bf16.msra.mxu1 %v1335_v15  ;;  %v184_v51 = vcombine.high %v161_v44, %v175_v45  ;;  %v183_v53 = vcombine.low %v161_v44, %v175_v45  ;;  %v186_v2 = vcombine.high %v168_v57, %v182_v61  ;;  %v185_v3 = vcombine.low %v168_v57, %v182_v61  ;;  %v1367_v6 = vld [vmem:[#allocation3 + $0x108] sm:$0xff]   ;;  %v1369_v8 = vld [vmem:[#allocation3 + $0x110] sm:$0xff]   ;;  %v1372_v11 = vld [vmem:[#allocation3 + $0x160] sm:$0xff]  }
  0x23   :  { %1204 = vmatprep.subr.bf16.mxu1 %v1338_v18  ;;  %v115_v63 = vcombine.high %v97_v55, %v111_v56  ;;  %v114_v0 = vcombine.low %v97_v55, %v111_v56  ;;  %v1373_v12 = vld [vmem:[#allocation3 + $0x120] sm:$0xff]   ;;  %v1374_v14 = vld [vmem:[#allocation3 + $0x168] sm:$0xff]   ;;  %v1376_v24 = vld [vmem:[#allocation3 + $0x170] sm:$0xff]  }
  0x24   :  { %1183 = vmatpush3.bf16.msra.mxu0 %v1337_v17  ;;  %v237_v59 = vpack.c.bf16 %v184_v51, %v113_v50  ;;  %v236_v60 = vpack.c.bf16 %v183_v53, %v112_v52  ;;  %v1380_v13 = vld [vmem:[#allocation3 + $0x180] sm:$0xff]   ;;  %v1381_v15 = vld [vmem:[%s1660_s0 + $0x8] ss:$14 sps:$4 sm:$0xff]   ;;  %v1383_v16 = vld [vmem:[%s1660_s0 + $0xc] ss:$14 sps:$4 sm:$0x33]  }
  0x25   :  { %1184 = vmatprep.subr.bf16.mxu0 %v1340_v20  ;;  %v239_v4 = vpack.c.bf16 %v186_v2, %v115_v63  ;;  %v238_v5 = vpack.c.bf16 %v185_v3, %v114_v0  ;;  %v1384_v17 = vld [vmem:[%s1660_s0 + $0x24] ss:$14 sps:$4 sm:$0xff]   ;;  %v1386_v18 = vld [vmem:[%s1660_s0 + $0x28] ss:$14 sps:$4 sm:$0x33]   ;;  %v126_v20 = vrot.slane %v1381_v15, %v1501_v36  ;;  %v1379_v40 = vld [vmem:[#allocation3 + $0x138] sm:$0xff]  }
  0x26   :  { %1205 = vmatpush3.bf16.msra.mxu1 %v1339_v19  ;;  %678 = vmatprep.mubr.bf16.mxu0 %v237_v59  ;;  %v1375_v19 = vld [vmem:[#allocation3 + $0x128] sm:$0xff]   ;;  %v140_v25 = vrot.slane %v1384_v17, %v1501_v36  ;;  %v147_v26 = vrot.slane %v1386_v18, %v1501_v36  ;;  %v1377_v31 = vld [vmem:[#allocation3 + $0x130] sm:$0xff]   ;;  %v1393_v45 = vld [vmem:[%s1663_s3] sm:$0xff]  }
  0x27   :  { %1206 = vmatprep.subr.bf16.mxu1 %v1342_v22  ;;  %719 = vmatprep.mubr.bf16.mxu1 %v239_v4  ;;  %v1387_v22 = vld [vmem:[%s1660_s0 + $0x40] ss:$14 sps:$4 sm:$0xff]   ;;  %v1396_v48 = vld [vmem:[%s1663_s3 + $0x18] sm:$0xff]  }
  0x28   :  { %1185 = vmatpush3.bf16.msra.mxu0 %v1341_v21  ;;  %v133_v21 = vrot.slane %v1383_v16, %v1501_v36  ;;  %v149_v32 = vcombine.high %v126_v20, %v140_v25  ;;  %v148_v43 = vcombine.low %v126_v20, %v140_v25  ;;  %v1395_v47 = vld [vmem:[%s1663_s3 + $0x10] sm:$0xff]   ;;  %v1397_v49 = vld [vmem:[%s1663_s3 + $0x20] sm:$0xff]   ;;  %v1398_v50 = vld [vmem:[%s1663_s3 + $0x28] sm:$0xff]  }
  0x29   :  { %1186 = vmatprep.subr.bf16.mxu0 %v1344_v27  ;;  %v1390_v27 = vld [vmem:[%s1660_s0 + $0x5c] ss:$14 sps:$4 sm:$0xff]   ;;  %v1399_v51 = vld [vmem:[%s1663_s3 + $0x30] sm:$0xff]   ;;  %v1401_v53 = vld [vmem:[%s1665_s5] sm:$0xff]  }
  0x2a   :  { %1207 = vmatpush3.bf16.msra.mxu1 %v1343_v23  ;;  %v1389_v23 = vld [vmem:[%s1660_s0 + $0x44] ss:$14 sps:$4 sm:$0x33]   ;;  %v150_v37 = vcombine.low %v133_v21, %v147_v26  ;;  %v1400_v52 = vld [vmem:[%s1663_s3 + $0x38] sm:$0xff]   ;;  %v1402_v54 = vld [vmem:[%s1665_s5 + $0x8] sm:$0xff]  }
  0x2b   :  { %1208 = vmatprep.subr.bf16.mxu1 %v1346_v29  ;;  %v197_v29 = vrot.slane %v1387_v22, %v1501_v36  ;;  %v1403_v55 = vld [vmem:[%s1665_s5 + $0x10] sm:$0xff]   ;;  %v1404_v56 = vld [vmem:[%s1665_s5 + $0x18] sm:$0xff]   ;;  %v1405_v57 = vld [vmem:[%s1665_s5 + $0x20] sm:$0xff]  }
  0x2c   :  { %1187 = vmatpush3.bf16.msra.mxu0 %v1345_v28  ;;  %v1392_v28 = vld [vmem:[%s1660_s0 + $0x60] ss:$14 sps:$4 sm:$0x33]  }
  0x2d   :  { %1188 = vmatprep.subr.bf16.mxu0 %v1348_v33  ;;  %v211_v33 = vrot.slane %v1390_v27, %v1501_v36  ;;  %v1406_v59 = vld [vmem:[%s1665_s5 + $0x28] sm:$0xff]   ;;  %v1105_v61 = vld [vmem:[%s1662_s2] ss:$0 sm:$0xff] }
  0x2e   :  { %1209 = vmatpush3.bf16.msra.mxu1 %v1347_v30  ;;  %v204_v30 = vrot.slane %v1389_v23, %v1501_v36 }
  0x2f   :  { %1210 = vmatprep.subr.bf16.mxu1 %v1350_v35  ;;  %v1378_v35 = vld [vmem:[#allocation3 + $0x178] sm:$0xff]   ;;  %v220_v38 = vcombine.high %v197_v29, %v211_v33  ;;  %v219_v44 = vcombine.low %v197_v29, %v211_v33 }
  0x30   :  { %1189 = vmatpush3.bf16.msra.mxu0 %v1349_v34  ;;  %v218_v34 = vrot.slane %v1392_v28, %v1501_v36  ;;  %v1408_v33 = vld [vmem:[%s1665_s5 + $0x38] sm:$0xff]  }
  0x31   :  { %1218 = vmatprep.subr.bf16.mxu0 %v1360_v46  ;;  %v241_v41 = vpack.c.bf16 %v220_v38, %v149_v32  ;;  %v240_v36 = vpack.c.bf16 %v219_v44, %v148_v43  ;;  %v1394_v46 = vld [vmem:[%s1663_s3 + $0x8] sm:$0xff]   ;;  %v1407_v32 = vld [vmem:[%s1665_s5 + $0x30] sm:$0xff]  }
  0x32   :  { %1211 = vmatpush3.bf16.msra.mxu1 %v1359_v42  ;;  %v221_v39 = vcombine.low %v204_v30, %v218_v34  ;;  %v1156_v34 = vld [vmem:[%s1664_s4] ss:$0 sm:$0xff] }
  0x33   :  { %1262 = vmatprep.subr.bf16.mxu1 %v1437_v58  ;;  %679 = vmatmul.mubr.bf16.vlgmr.msra.gmra.mrb[0].mxu0 %v236_v60 }
  0x34   :  { %1219 = vmatpush3.bf16.msra.mxu0 %v1365_v62  ;;  %v242_v42 = vpack.c.bf16 %v221_v39, %v150_v37  ;;  %760 = vmatprep.mubr.bf16.mxu0 %v241_v41 }
  0x35   :  { %1220 = vmatprep.subr.bf16.mxu0 %v1366_v1  ;;  %720 = vmatmul.mubr.bf16.vlgmr.msra.gmra.mrb[0].mxu1 %v238_v5 }
  0x36   :  { %1264 = vmatprep.mubr.msk.bf16.mxu1 %vm1438_vm0, %v1437_v58  ;;  %1263 = vmatpush3.bf16.msra.mxu1 %v1380_v13 }
  0x37   :  { %1268 = vmatprep.subr.bf16.mxu1 %v1437_v58 }
  0x38   :  { %1221 = vmatpush3.bf16.msra.mxu0 %v1367_v6 }
  0x39   :  { %1222 = vmatprep.subr.bf16.mxu0 %v1368_v7 }
  0x3c   :  { %1223 = vmatpush3.bf16.msra.mxu0 %v1369_v8 }
  0x3d   :  { %1224 = vmatprep.subr.bf16.mxu0 %v1370_v9  ;;  %1265 = vmatmul.mubr.msk.bf16.vlgmr.msra.gmra.mrb[4].mxu1 %vm642_vm1, %v242_v42 }
  0x3e   :  { %1284 = vmatprep.mubr.msk.bf16.mxu1 %vm1438_vm0, %v1437_v58  ;;  %1269 = vmatpush3.bf16.msra.mxu1 %v1393_v45  ;;  %v1165_v45 = vld [vmem:[%s1666_s6] ss:$0 sm:$0xff] }
  0x3f   :  { %1270 = vmatprep.subr.bf16.mxu1 %v1437_v58 }
  0x40   :  { %1225 = vmatpush3.bf16.msra.mxu0 %v1371_v10 }
  0x41   :  { %1226 = vmatprep.subr.bf16.mxu0 %v1372_v11 }
  0x42   :  { %1271 = vmatpush3.bf16.msra.mxu1 %v1394_v46 }
  0x43   :  { %1272 = vmatprep.subr.bf16.mxu1 %v1437_v58 }
  0x44   :  { %1227 = vmatpush3.bf16.msra.mxu0 %v1373_v12 }
  0x45   :  { %1228 = vmatprep.subr.bf16.mxu0 %v1374_v14 }
  0x46   :  { %1273 = vmatpush3.bf16.msra.mxu1 %v1395_v47 }
  0x47   :  { %1274 = vmatprep.subr.bf16.mxu1 %v1437_v58 }
  0x48   :  { %1229 = vmatpush3.bf16.msra.mxu0 %v1375_v19 }
  0x49   :  { %1230 = vmatprep.subr.bf16.mxu0 %v1376_v24 }
  0x4a   :  { %1275 = vmatpush3.bf16.msra.mxu1 %v1396_v48 }
  0x4b   :  { %1276 = vmatprep.subr.bf16.mxu1 %v1437_v58 }
  0x4c   :  { %1231 = vmatpush3.bf16.msra.mxu0 %v1377_v31 }
  0x4d   :  { %1232 = vmatprep.subr.bf16.mxu0 %v1378_v35 }
  0x4e   :  { %1277 = vmatpush3.bf16.msra.mxu1 %v1397_v49 }
  0x4f   :  { %1278 = vmatprep.subr.bf16.mxu1 %v1437_v58 }
  0x50   :  { %1233 = vmatpush3.bf16.msra.mxu0 %v1379_v40 }
  0x51   :  { %1288 = vmatprep.subr.bf16.mxu0 %v1437_v58 }
  0x52   :  { %1279 = vmatpush3.bf16.msra.mxu1 %v1398_v50 }
  0x53   :  { %761 = vmatmul.mubr.bf16.vlgmr.msra.gmra.mrb[4].mxu0 %v240_v36  ;;  %1280 = vmatprep.subr.bf16.mxu1 %v1437_v58 }
  0x54   :  { %1304 = vmatprep.mubr.msk.bf16.mxu0 %vm1438_vm0, %v1437_v58  ;;  %1289 = vmatpush3.bf16.msra.mxu0 %v1401_v53 }
  0x55   :  { %1290 = vmatprep.subr.bf16.mxu0 %v1437_v58 }
  0x56   :  { %1281 = vmatpush3.bf16.msra.mxu1 %v1399_v51 }
  0x57   :  { %1282 = vmatprep.subr.bf16.mxu1 %v1437_v58 }
  0x58   :  { %1291 = vmatpush3.bf16.msra.mxu0 %v1402_v54 }
  0x59   :  { %1292 = vmatprep.subr.bf16.mxu0 %v1437_v58 }
  0x5a   :  { %1283 = vmatpush3.bf16.msra.mxu1 %v1400_v52 }
  0x5b   :  { %1308 = vmatprep.subr.bf16.mxu1 %v1437_v58 }
  0x5c   :  { %1293 = vmatpush3.bf16.msra.mxu0 %v1403_v55 }
  0x5d   :  { %1294 = vmatprep.subr.bf16.mxu0 %v1437_v58 }
  0x60   :  { %1295 = vmatpush3.bf16.msra.mxu0 %v1404_v56 }
  0x61   :  { %1296 = vmatprep.subr.bf16.mxu0 %v1437_v58 }
  0x64   :  { %1297 = vmatpush3.bf16.msra.mxu0 %v1405_v57  ;;  %v1054_v57 = vld [vmem:[%s1667_s7] sm:$0x1] }
  0x65   :  { %1298 = vmatprep.subr.bf16.mxu0 %v1437_v58 }
  0x68   :  { %1299 = vmatpush3.bf16.msra.mxu0 %v1406_v59  ;;  %v1057_v59 = vstv %s1668_s8 }
  0x69   :  { %1300 = vmatprep.subr.bf16.mxu0 %v1437_v58 }
  0x6c   :  { %1301 = vmatpush3.bf16.msra.mxu0 %v1407_v32 }
  0x6d   :  { %1302 = vmatprep.subr.bf16.mxu0 %v1437_v58 }
  0x70   :  { %1303 = vmatpush3.bf16.msra.mxu0 %v1408_v33 }
 0x106   :  { %v1190_v60 = vpop.f32.mrb[0].mxu0 }
 0x107   :  { %v1191_v62 = vpop.f32.mrb[1].mxu0 }
 0x108   :  { %v1192_v63 = vadd.f32 %v1191_v62, %v1190_v60  ;;  %v1193_v0 = vpop.f32.mrb[2].mxu0  ;;  %v1212_v3 = vpop.f32.mrb[0].mxu1 }
 0x109   :  { %v1194_v1 = vpop.f32.mrb[3].mxu0  ;;  %v1213_v5 = vpop.f32.mrb[1].mxu1 }
 0x10a   :  { %v681_v2 = vadd.f32 %v1192_v63, %v1105_v61  ;;  %v1195_v4 = vadd.f32 %v1194_v1, %v1193_v0  ;;  %v1214_v7 = vadd.f32 %v1213_v5, %v1212_v3  ;;  %v1215_v8 = vpop.f32.mrb[2].mxu1 }
 0x10b   :  { %v1216_v9 = vpop.f32.mrb[3].mxu1 }
 0x10c   :  { %v684_v6 = vadd.f32 %v1195_v4, %v1105_v61  ;;  %v722_v10 = vadd.f32 %v1214_v7, %v681_v2  ;;  %v1217_v11 = vadd.f32 %v1216_v9, %v1215_v8 }
 0x10e   :  { %v725_v12 = vadd.f32 %v1217_v11, %v684_v6 }
 0x110   :  { %v803_v13 = vpop.f32.mrb[4].mxu1 }
 0x111   :  { %v1266_v14 = vpop.f32.mrb[5].mxu1 }
 0x112   :  { %v806_v15 = vpop.f32.mrb[6].mxu1 }
 0x113   :  { %v1267_v16 = vpop.f32.mrb[7].mxu1 }
 0x126   :  { %v1234_v17 = vpop.f32.mrb[4].mxu0 }
 0x127   :  { %v1235_v18 = vpop.f32.mrb[5].mxu0 }
 0x128   :  { %v1236_v19 = vadd.f32 %v1235_v18, %v1234_v17  ;;  %v1237_v20 = vpop.f32.mrb[6].mxu0 }
 0x129   :  { %v1238_v21 = vpop.f32.mrb[7].mxu0 }
 0x12a   :  { %v763_v22 = vadd.f32 %v1236_v19, %v722_v10  ;;  %v1239_v23 = vadd.f32 %v1238_v21, %v1237_v20 }
 0x12c   :  { %v804_v24 = vadd.f32 %v803_v13, %v763_v22  ;;  %v766_v25 = vadd.f32 %v1239_v23, %v725_v12 }
 0x12e   :  { %v812_v26 = vmul.f32 0.2, %v804_v24  ;;  %v807_v27 = vadd.f32 %v806_v15, %v766_v25  ;;  %vm810_vm2 = vcmp.gt.f32.partialorder %v804_v24, 0.0 }
 0x130   :  { %vm811_vm3 = vcmp.gt.f32.partialorder %v807_v27, 0.0  ;;  %v813_v28 = vmul.f32 0.2, %v807_v27  ;;  %v814_v29 = vsel %vm810_vm2, %v804_v24, %v812_v26 }
 0x132   :  { %v815_v30 = vsel %vm811_vm3, %v807_v27, %v813_v28 }
 0x133   :  { %v816_v31 = vpack.c.bf16 %v815_v30, %v814_v29 }
 0x135   :  { %1285 = vmatmul.mubr.bf16.vlgmr.msra.gmra.mrb[8].mxu1 %v816_v31 }
 0x136   :  { %1310 = vmatprep.mubr.msk.bf16.mxu1 %vm1438_vm0, %v1437_v58 }
 0x208   :  { %v922_v35 = vpop.f32.mrb[8].mxu1 }
 0x209   :  { %v923_v37 = vadd.f32 %v1156_v34, %v922_v35  ;;  %v1286_v38 = vpop.f32.mrb[9].mxu1 }
 0x20a   :  { %v925_v39 = vpop.f32.mrb[10].mxu1 }
 0x20b   :  { %v931_v40 = vmul.f32 0.2, %v923_v37  ;;  %v926_v41 = vadd.f32 %v1156_v34, %v925_v39  ;;  %v1287_v42 = vpop.f32.mrb[11].mxu1  ;;  %vm929_vm4 = vcmp.gt.f32.partialorder %v923_v37, 0.0 }
 0x20d   :  { %vm930_vm5 = vcmp.gt.f32.partialorder %v926_v41, 0.0  ;;  %v932_v43 = vmul.f32 0.2, %v926_v41  ;;  %v933_v58 = vsel %vm929_vm4, %v923_v37, %v931_v40 }
 0x20f   :  { %v934_v44 = vsel %vm930_vm5, %v926_v41, %v932_v43 }
 0x210   :  { %v935_v36 = vpack.c.bf16 %v934_v44, %v933_v58 }
 0x212   :  { %1305 = vmatmul.mubr.bf16.vlgmr.msra.gmra.mrb[8].mxu0 %v935_v36 }
 0x2e5   :  { %v1041_v46 = vpop.f32.mrb[8].mxu0 }
 0x2e6   :  { %v1042_v47 = vadd.f32 %v1165_v45, %v1041_v46  ;;  %v1306_v48 = vpop.f32.mrb[9].mxu0 }
 0x2e7   :  { %v1044_v49 = vpop.f32.mrb[10].mxu0 }
 0x2e8   :  { %v1050_v50 = vmul.f32 0.2, %v1042_v47  ;;  %v1045_v51 = vadd.f32 %v1165_v45, %v1044_v49  ;;  %v1307_v52 = vpop.f32.mrb[11].mxu0  ;;  %vm1048_vm6 = vcmp.gt.f32.partialorder %v1042_v47, 0.0 }
 0x2ea   :  { %vm1049_vm7 = vcmp.gt.f32.partialorder %v1045_v51, 0.0  ;;  %v1051_v53 = vmul.f32 0.2, %v1045_v51  ;;  %v1052_v54 = vsel %vm1048_vm6, %v1042_v47, %v1050_v50 }
 0x2ec   :  { %v1053_v55 = vsel %vm1049_vm7, %v1045_v51, %v1051_v53 }
 0x2ed   :  { %v1055_v56 = vpack.c.bf16 %v1053_v55, %v1052_v54 }
 0x2ef   :  { %1309 = vmatpush3.bf16.xpose.msra.mxu1 %v1055_v56 }
 0x2f6   :  { %1311 = vmatmul.mubr.bf16.vlgmr.msra.gmra.mrb[12].mxu1 %v1054_v57 }
 0x3c9   :  { %v1092_v60 = vpop.f32.mrb[12].mxu1 }
 0x3ca   :  { %v1093_v61 = vadd.f32 %v1092_v60, %v1057_v59  ;;  %v1312_v62 = vpop.f32.mrb[13].mxu1 }
 0x3cb   :  { %v1095_v63 = vpop.f32.mrb[14].mxu1 }
 0x3cc   :  { %1099 = vst.msk [vmem:[%s1669_s9] sm:$0x1] %vm1098_vm8, %v1093_v61  ;;  %v1313_v0 = vpop.f32.mrb[15].mxu1 }
 0x3cd   :  { %1104 = vsyncpa [#allocation4], 1 }

</bundles_post_ra>
